<compile_context>
chip_gen: v5e
topology: v5e:2x2
jax: 0.10.0
libtpu: 0.0.40
codegen_flags: <defaults>
</compile_context>

<pallas_src>
import jax
import jax.numpy as jnp
from jax.experimental import pallas as pl
from jax.experimental.pallas import tpu as pltpu

_K = 4                 # input features of the Linear layer
_LANE = 128
_SPR = _LANE // _K     # samples packed per 128-lane row = 32


def _logreg_kernel(x_ref, wmat_ref, b_ref, o_ref):
    # x_ref:    (tr, 128) f32 VMEM -- 32 samples x 4 features per row
    # wmat_ref: (128, 32) f32 VMEM -- block-scatter weights (resident)
    # b_ref:    (1,)      f32 SMEM -- bias scalar
    # o_ref:    (tr, 32)  f32 VMEM -- sigmoid(z), sample s = row*32 + col
    z = jnp.dot(x_ref[...], wmat_ref[...], preferred_element_type=jnp.float32)
    z = z + b_ref[0]
    # sigmoid(z) = 0.5 + 0.5 * tanh(0.5 * z): single EUP op, no exp overflow.
    o_ref[...] = (0.5 + 0.5 * jnp.tanh(0.5 * z)).astype(o_ref.dtype)


def _round_up(n, m):
    return ((n + m - 1) // m) * m


def mpg_logistic_regression(x, weight, bias, *,
                            rows_per_tile_max=4096,
                            xla_fastpath_threshold=16384):
    """x: (B, 4) f32, weight: (1, 4) f32 (PyTorch layout), bias: (1,) f32 -> (B, 1) f32."""
    B, K = x.shape
    assert K == _K, "MPGLogisticRegressionModel expects 4 input features"
    assert weight.shape == (1, _K)

    x = x.astype(jnp.float32)
    w = weight.reshape(_K).astype(jnp.float32)
    b = bias.reshape(1).astype(jnp.float32)

    # Small-batch fast path: pallas_call fixed cost dominates below ~16K rows.
    if B < xla_fastpath_threshold:
        return jax.nn.sigmoid(x @ w.reshape(_K, 1) + b)

    return _mpg_logreg_pallas(x, w, b, rows_per_tile_max=rows_per_tile_max)


def _mpg_logreg_pallas(x, w, b, *, rows_per_tile_max=4096):
    B = x.shape[0]

    # Pad only to the 32-sample packing granularity (no copy when already aligned).
    b_pad = _round_up(B, _SPR)
    if b_pad != B:
        x = jnp.pad(x, ((0, b_pad - B), (0, 0)))
    rows = b_pad // _SPR

    # Zero-copy, lane-dense view: row r holds samples r*32 .. r*32+31.
    x2d = x.reshape(rows, _LANE)

    # Block-scatter weight matrix: wmat[l, c] = w[l % 4] if l // 4 == c else 0,
    # so (x2d @ wmat)[r, c] = sum_k x[r*32 + c, k] * w[k].
    lane = jnp.arange(_LANE)
    wmat = jnp.where((lane[:, None] // _K) == jnp.arange(_SPR)[None, :],
                     w[lane % _K][:, None], 0.0).astype(jnp.float32)

    # Tile the row axis: multiple of 8 sublanes, aim for >= ~8 grid steps so
    # both v7x TensorCores get work and per-step overhead amortizes; cap so
    # double-buffered blocks stay well inside default scoped VMEM everywhere.
    if rows <= 8:
        tr = rows                      # single block; second-minor == full dim
    else:
        tr = min(rows_per_tile_max, max(8, _round_up(pl.cdiv(rows, 8), 8)))
    n_tiles = pl.cdiv(rows, tr)        # partial last tile handled by Pallas

    out2d = pl.pallas_call(
        _logreg_kernel,
        out_shape=jax.ShapeDtypeStruct((rows, _SPR), jnp.float32),
        grid_spec=pltpu.PrefetchScalarGridSpec(
            num_scalar_prefetch=0,
            grid=(n_tiles,),
            in_specs=[
                pl.BlockSpec((tr, _LANE), lambda i: (i, 0)),     # x rows tile
                pl.BlockSpec((_LANE, _SPR), lambda i: (0, 0)),   # resident weights
                pl.BlockSpec(memory_space=pltpu.MemorySpace.SMEM),  # bias scalar
            ],
            out_specs=pl.BlockSpec((tr, _SPR), lambda i: (i, 0)),
        ),
        compiler_params=pltpu.CompilerParams(
            dimension_semantics=("parallel",),
        ),
    )(x2d, wmat, b)

    # (rows, 32) -> (B, 1): flatten (free), drop packing pad, add trailing dim.
    return out2d.reshape(-1)[:B].reshape(B, 1)


def _init_linear_params(key, in_features, out_features):
    # Deterministic init mimicking nn.Linear default: U(-1/sqrt(fan_in), +1/sqrt(fan_in))
    kw, kb = jax.random.split(key)
    bound = 1.0 / jnp.sqrt(jnp.float32(in_features))
    weight = jax.random.uniform(kw, (out_features, in_features),
                                minval=-bound, maxval=bound, dtype=jnp.float32)
    bias = jax.random.uniform(kb, (out_features,),
                              minval=-bound, maxval=bound, dtype=jnp.float32)
    return weight, bias


def _reference(x, weight, bias):
    return jax.nn.sigmoid(x @ weight.T + bias)


if __name__ == "__main__":
    key = jax.random.PRNGKey(0)
    k_x, k_p, k_x2 = jax.random.split(key, 3)

    in_features, out_features = 4, 1
    weight, bias = _init_linear_params(k_p, in_features, out_features)

    # Small batch consistent with the module (B=8, K=4); force the Pallas path.
    batch = 8
    x = jax.random.normal(k_x, (batch, in_features), dtype=jnp.float32)
    out = mpg_logistic_regression(x, weight, bias, xla_fastpath_threshold=0)
    jax.block_until_ready(out)
    ref = _reference(x, weight, bias)
    assert out.shape == (batch, out_features)
    assert jnp.allclose(out, ref, atol=1e-4, rtol=1e-4)

    # Multi-tile + unaligned batch path (B=300 -> padded to 320 samples, 10 rows,
    # two grid steps with a partial boundary block).
    batch2 = 300
    x2 = jax.random.normal(k_x2, (batch2, in_features), dtype=jnp.float32)
    out2 = mpg_logistic_regression(x2, weight, bias, xla_fastpath_threshold=0)
    jax.block_until_ready(out2)
    ref2 = _reference(x2, weight, bias)
    assert out2.shape == (batch2, out_features)
    assert jnp.allclose(out2, ref2, atol=1e-4, rtol=1e-4)

    # Also exercise the default small-batch XLA fast path.
    out3 = mpg_logistic_regression(x, weight, bias)
    jax.block_until_ready(out3)
    assert jnp.allclose(out3, ref, atol=1e-5, rtol=1e-5)

    print("KERNEL_OK")
</pallas_src>

<mosaic_0001>
module attributes {stable_mosaic.version = 11 : i64} {
  func.func @_logreg_kernel(%arg0: i32, %arg1: memref<1x128xf32, #tpu.memory_space<vmem>>, %arg2: memref<128x32xf32, #tpu.memory_space<vmem>>, %arg3: memref<1xf32, #tpu.memory_space<smem>>, %arg4: memref<1x32xf32, #tpu.memory_space<vmem>>) attributes {dimension_semantics = [#tpu.dimension_semantics<parallel>], iteration_bounds = array<i64: 1>, scalar_prefetch = 0 : i64, scratch_operands = 0 : i64, tpu.core_type = #tpu.core_type<tc>, window_params = [{transform_indices = @transform_0, window_bounds = array<i64: 1, 128>}, {pipeline_mode = #tpu.pipeline_mode<synchronous>, transform_indices = @transform_1, window_bounds = array<i64: 128, 32>}, {transform_indices = @transform_2, window_bounds = array<i64: 1>}, {transform_indices = @transform_3, window_bounds = array<i64: 1, 32>}]} {
    %c0 = arith.constant 0 : index
    %c0_0 = arith.constant 0 : index
    %0 = vector.load %arg1[%c0, %c0_0] : memref<1x128xf32, #tpu.memory_space<vmem>>, vector<1x128xf32>
    %c0_1 = arith.constant 0 : index
    %c0_2 = arith.constant 0 : index
    %1 = vector.load %arg2[%c0_1, %c0_2] : memref<128x32xf32, #tpu.memory_space<vmem>>, vector<128x32xf32>
    %cst = arith.constant dense<0.000000e+00> : vector<1x32xf32>
    %2 = tpu.matmul %0, %1, %cst {dimension_numbers = #tpu.dot_dimension_numbers<[1], [0], [0], [1], [0, 0, 1, 1], [], []>} : vector<1x128xf32>, vector<128x32xf32>, vector<1x32xf32> -> vector<1x32xf32>
    %c0_3 = arith.constant 0 : index
    %3 = memref.load %arg3[%c0_3] : memref<1xf32, #tpu.memory_space<smem>>
    %4 = vector.broadcast %3 : f32 to vector<1x32xf32>
    %5 = arith.addf %2, %4 : vector<1x32xf32>
    %cst_4 = arith.constant 5.000000e-01 : f32
    %6 = vector.broadcast %cst_4 : f32 to vector<1x32xf32>
    %7 = arith.mulf %6, %5 : vector<1x32xf32>
    %8 = math.tanh %7 : vector<1x32xf32>
    %cst_5 = arith.constant 5.000000e-01 : f32
    %9 = vector.broadcast %cst_5 : f32 to vector<1x32xf32>
    %10 = arith.mulf %9, %8 : vector<1x32xf32>
    %cst_6 = arith.constant 5.000000e-01 : f32
    %11 = vector.broadcast %cst_6 : f32 to vector<1x32xf32>
    %12 = arith.addf %11, %10 : vector<1x32xf32>
    %c0_7 = arith.constant 0 : index
    %c0_8 = arith.constant 0 : index
    %13 = vector.load %arg4[%c0_7, %c0_8] : memref<1x32xf32, #tpu.memory_space<vmem>>, vector<1x32xf32>
    tpu.vector_store %arg4[%c0_7, %c0_8], %12 {strides = array<i32>} : memref<1x32xf32, #tpu.memory_space<vmem>>, vector<1x32xf32>,
    return
  }
  func.func @transform_0(%arg0: i32) -> (i32, i32) {
    %c0_i32 = arith.constant 0 : i32
    %c0_i32_0 = arith.constant 0 : i32
    return %arg0, %c0_i32 : i32, i32
  }
  func.func @transform_1(%arg0: i32) -> (i32, i32) {
    %c0_i32 = arith.constant 0 : i32
    %c0_i32_0 = arith.constant 0 : i32
    %c0_i32_1 = arith.constant 0 : i32
    return %c0_i32, %c0_i32_0 : i32, i32
  }
  func.func @transform_2(%arg0: i32) -> i32 {
    %c0_i32 = arith.constant 0 : i32
    %c0_i32_0 = arith.constant 0 : i32
    return %c0_i32 : i32
  }
  func.func @transform_3(%arg0: i32) -> (i32, i32) {
    %c0_i32 = arith.constant 0 : i32
    %c0_i32_0 = arith.constant 0 : i32
    return %arg0, %c0_i32 : i32, i32
  }
}

</mosaic_0001>

<bundles_post_ra>
// kernel: tpu_custom_call.1
= control target key start
LH: loop header
LB: loop body
LE: loop exit
PB: predicated region body
PF: predicated region fallthrough
CT: control target
= control target key end

     0   :  { %s184_s0 = inlined_call_operand.vmem [shape: f32[1,128], index: 0, kind: input, shape index: {}]   ;;  %s185_s1 = inlined_call_operand.vmem [shape: f32[128,32], index: 1, kind: input, shape index: {}]   ;;  %s186_s2 = inlined_call_operand.<no memory space> [shape: f32[1], index: 2, kind: input, shape index: {}]   ;;  %s187_s3 = inlined_call_operand.hbm [shape: f32[1,32], index: 3, kind: output, shape index: {}]  }
   0x1   :  { %v32_v0 = vld [vmem:[%s185_s1 + $0x78] sm:$0xff]  ;;  %v31_v1 = vld [vmem:[%s185_s1 + $0x70] sm:$0xff]  ;;  %v30_v2 = vld [vmem:[%s185_s1 + $0x68] sm:$0xff] }
   0x2   :  { %35 = vmatpush.msra.mxu0 %v32_v0  ;;  %v29_v3 = vld [vmem:[%s185_s1 + $0x60] sm:$0xff] }
   0x4   :  { %36 = vmatpush.msra.mxu0 %v31_v1 }
   0x6   :  { %37 = vmatpush.msra.mxu0 %v30_v2 }
   0x7   :  { %9 = vsyncpa [#allocation4], 0  ;;  %v28_v4 = vld [vmem:[%s185_s1 + $0x58] sm:$0xff]  ;;  %v27_v5 = vld [vmem:[%s185_s1 + $0x50] sm:$0xff]  ;;  %v34_v17 = vstv %s186_s2  ;;  %s106_s21 = smov [#allocation3]   ;;  %s68_s24 = sshll.u32 %s187_s3, 4  ;;  %s69_s24 = int_to_ptr.hbm [resolvable:$true] %s68_s24 }
   0x8   :  { %38 = vmatpush.msra.mxu0 %v29_v3  ;;  %v26_v6 = vld [vmem:[%s185_s1 + $0x48] sm:$0xff]  ;;  %v25_v7 = vld [vmem:[%s185_s1 + $0x40] sm:$0xff]  ;;  %v24_v8 = vld [vmem:[%s185_s1 + $0x38] sm:$0xff]  ;;  %s66_s22 = sshll.u32 %s106_s21, 4  ;;  %vm59_vm0 = vcmask 253952   ;;  %s67_s22 = int_to_ptr.vmem [resolvable:$true] %s66_s22 }
   0x9   :  { %v23_v9 = vld [vmem:[%s185_s1 + $0x30] sm:$0xff]  ;;  %v22_v10 = vld [vmem:[%s185_s1 + $0x28] sm:$0xff]  ;;  %v21_v11 = vld [vmem:[%s185_s1 + $0x20] sm:$0xff] }
   0xa   :  { %39 = vmatpush.msra.mxu0 %v28_v4  ;;  %v20_v12 = vld [vmem:[%s185_s1 + $0x18] sm:$0xff]  ;;  %v19_v13 = vld [vmem:[%s185_s1 + $0x10] sm:$0xff]  ;;  %v18_v14 = vld [vmem:[%s185_s1 + $0x8] sm:$0xff] }
   0xb   :  { %v17_v15 = vld [vmem:[%s185_s1] sm:$0xff] }
   0xc   :  { %40 = vmatpush.msra.mxu0 %v27_v5  ;;  %v16_v16 = vld [vmem:[%s184_s0] sm:$0x1] }
   0xe   :  { %41 = vmatpush.msra.mxu0 %v26_v6 }
  0x10   :  { %42 = vmatpush.msra.mxu0 %v25_v7 }
  0x12   :  { %43 = vmatpush.msra.mxu0 %v24_v8 }
  0x14   :  { %44 = vmatpush.msra.mxu0 %v23_v9 }
  0x16   :  { %45 = vmatpush.msra.mxu0 %v22_v10 }
  0x18   :  { %46 = vmatpush.msra.mxu0 %v21_v11 }
  0x1a   :  { %47 = vmatpush.msra.mxu0 %v20_v12 }
  0x1c   :  { %48 = vmatpush.msra.mxu0 %v19_v13 }
  0x1e   :  { %49 = vmatpush.msra.mxu0 %v18_v14 }
  0x20   :  { %50 = vmatpush.msra.mxu0 %v17_v15 }
  0x21   :  { %51 = vmatmul.f32.vlgmr.msra.gmra.mxu0 %v16_v16 }
  0x9e   :  { %v52_v18 = vpop.f32.mrf.mxu0 }
  0x9f   :  { %v53_v19 = vadd.f32 %v52_v18, %v34_v17 }
  0xa1   :  { %v55_v20 = vmul.f32 0.5, %v53_v19 }
  0xa3   :  { %78 = vtanh.f32 %v55_v20 }
  0xa9   :  { %v79_v21 = vpop.eup %78 }
  0xaa   :  { %v57_v22 = vmul.f32 0.5, %v79_v21 }
  0xac   :  { %v58_v23 = vadd.f32 0.5, %v57_v22 }
  0xae   :  { %60 = vst.msk [vmem:[#allocation3] sm:$0x1] %vm59_vm0, %v58_v23 }
  0xaf   :  { %71 = dma.vmem_to_hbm [thread:$0]  %s67_s22, 16, %s69_s24, [#allocation4]  }
  0xb0   :  { %104 = dma.done.wait [#allocation4], 16  }
  0xb1   :  { %105 = vsyncadd [#allocation4], 4294967280 }
  0xb2   :  { %76 = vsyncpa [#allocation4], 1 }

</bundles_post_ra>
